<compile_context>
chip_gen: v7x
topology: tpu7x:2x2x1
jax: 0.10.0
libtpu: 0.0.40
codegen_flags: <defaults>
</compile_context>

<pallas_src>
import functools

import jax
import jax.numpy as jnp
from jax.experimental import pallas as pl
from jax.experimental.pallas import tpu as pltpu

D_IN, D_H1, D_H2, D_H3, D_OUT = 12, 57, 35, 35, 3


def _location_mlp_kernel(xt_ref, w1_ref, w2_ref, w3_ref, w4_ref, vec_ref, o_ref,
                         *, bf16_tanh):
    # xt_ref: (12, TILE) bf16   (batch on lanes -> lane-dense blocks everywhere)
    # w*_ref: (out, in)  bf16   (BN1-3 already folded in)
    # vec_ref: (64, 8)   f32    packed [b1 | b2 | b3 | b4 | s4 | t4] column vectors
    x = xt_ref[...]
    vec = vec_ref[...]
    b1 = vec[:D_H1, 0:1]
    b2 = vec[:D_H2, 1:2]
    b3 = vec[:D_H3, 2:3]
    b4 = vec[:D_OUT, 3:4]
    s4 = vec[:D_OUT, 4:5]
    t4 = vec[:D_OUT, 5:6]

    def hidden(w_ref, h_in, b):
        z = jnp.dot(w_ref[...], h_in, preferred_element_type=jnp.float32) + b
        if bf16_tanh:
            # v6e/v7x: bf16 EUP path -> ~2x tanh throughput, and the result is
            # already bf16 for the next MXU push (no separate VPU cast).
            return jnp.tanh(z.astype(jnp.bfloat16))
        # v5e: no bf16 EUP/VPU -> keep tanh in f32, cast only for the next matmul.
        return jnp.tanh(z).astype(jnp.bfloat16)

    h = hidden(w1_ref, x, b1)   # Dropout(p=0.35): identity in eval mode
    h = hidden(w2_ref, h, b2)   # Dropout(p=0.25): identity in eval mode
    h = hidden(w3_ref, h, b3)   # Dropout(p=0.15): identity in eval mode
    z = jnp.dot(w4_ref[...], h, preferred_element_type=jnp.float32) + b4  # (3, TILE)

    # Softmax over the feature axis (rows), numerically stabilized.
    z = z - jnp.max(z, axis=0, keepdims=True)
    e = jnp.exp(z)
    p = e * pl.reciprocal(jnp.sum(e, axis=0, keepdims=True), approx=True)

    # Final BatchNorm1d(3) (eval mode) as per-feature scale/shift.
    o_ref[...] = (p * s4 + t4).astype(o_ref.dtype)


def _pick_tile(n):
    # Large lane-dense tile amortizes the ~0.35 us per-grid-step overhead (the
    # kernel is EUP/overhead-bound, not MXU/DMA-bound).  Capped at 4096 so the
    # unrolled intermediates (~1 KB per batch element) plus double-buffered I/O
    # stay comfortably inside v5e's scoped VMEM.  Always require >= 2 tiles so
    # the grid can shard across both v7x TensorCores.
    for t in (4096, 2048, 1024, 512, 256):
        if n >= 2 * t:
            return t
    return 128


def _bf16_tanh_supported():
    # v6e / v7x EUP supports bf16 transcendentals; v5e and older do not.
    kind = jax.devices()[0].device_kind.lower()
    return not any(g in kind for g in ("v2", "v3", "v4", "v5"))


@functools.partial(jax.jit, static_argnames=("bf16_tanh",))
def _location_mlp_impl(x, w1, w2, w3, w4, vec, *, bf16_tanh):
    n = x.shape[0]
    tile = _pick_tile(n)
    # Pad the batch to an EVEN number of tiles: grid >= 2 steps, so v7x's two
    # TensorCores both get work (harmless on single-TC v5e/v6e).
    n_pad = pl.cdiv(n, 2 * tile) * 2 * tile

    # Feature-major (batch-on-lanes) bf16 input, zero-padded to whole tiles.
    # Under jit the cast/transpose/pad fuse into a single XLA prelude pass.
    xt = jnp.pad(x.astype(jnp.bfloat16).T, ((0, 0), (0, n_pad - n)))

    kernel = functools.partial(_location_mlp_kernel, bf16_tanh=bf16_tanh)
    out_t = pl.pallas_call(
        kernel,
        out_shape=jax.ShapeDtypeStruct((D_OUT, n_pad), jnp.float32),
        grid=(n_pad // tile,),
        in_specs=[
            pl.BlockSpec((D_IN, tile), lambda i: (0, i)),    # streamed input tiles
            pl.BlockSpec(w1.shape, lambda i: (0, 0)),         # params: constant index
            pl.BlockSpec(w2.shape, lambda i: (0, 0)),         # maps -> stay resident
            pl.BlockSpec(w3.shape, lambda i: (0, 0)),
            pl.BlockSpec(w4.shape, lambda i: (0, 0)),
            pl.BlockSpec(vec.shape, lambda i: (0, 0)),
        ],
        out_specs=pl.BlockSpec((D_OUT, tile), lambda i: (0, i)),
        compiler_params=pltpu.CompilerParams(
            dimension_semantics=("parallel",),                # shard batch across TCs
            vmem_limit_bytes=64 * 1024 * 1024,                # headroom for TILE=4096 on v5e
        ),
    )(xt, w1, w2, w3, w4, vec)

    return out_t[:, :n].T


def location_mlp(x, w1, w2, w3, w4, vec):
    """x: (N, 12) f32. Weights (out,in) bf16 with BN1-3 folded in; vec packed (64,8) f32."""
    return _location_mlp_impl(x, w1, w2, w3, w4, vec, bf16_tanh=_bf16_tanh_supported())


def make_params(key):
    """Deterministic synthetic parameters in PyTorch layout: (W(out,in), b, gamma, beta, mean, var) x4."""
    dims = [(D_IN, D_H1), (D_H1, D_H2), (D_H2, D_H3), (D_H3, D_OUT)]
    raw = []
    for (din, dout) in dims:
        key, kw, kb, kg, kbe, km, kv = jax.random.split(key, 7)
        bound = din ** -0.5
        w = jax.random.uniform(kw, (dout, din), jnp.float32, -bound, bound)
        b = jax.random.uniform(kb, (dout,), jnp.float32, -bound, bound)
        gamma = jax.random.uniform(kg, (dout,), jnp.float32, 0.5, 1.5)
        beta = jax.random.uniform(kbe, (dout,), jnp.float32, -0.5, 0.5)
        rmean = jax.random.uniform(km, (dout,), jnp.float32, -0.5, 0.5)
        rvar = jax.random.uniform(kv, (dout,), jnp.float32, 0.5, 1.5)
        raw.append((w, b, gamma, beta, rmean, rvar))
    return raw


def prepare_params(raw, eps=1e-5):
    """Fold eval-mode BN of layers 1-3 into the next Linear; pack the small vectors."""
    scales, shifts = [], []
    for (_, _, g, be, m, v) in raw:
        s = g / jnp.sqrt(v + eps)
        scales.append(s)
        shifts.append(be - m * s)

    ws = [raw[0][0]]                       # layer-1 weight unchanged
    bs = [raw[0][1]]
    for k in range(1, 4):
        w, b = raw[k][0], raw[k][1]
        ws.append(w * scales[k - 1][None, :])       # scale input columns by prev BN scale
        bs.append(w @ shifts[k - 1] + b)            # absorb prev BN shift into bias

    vec = jnp.zeros((64, 8), jnp.float32)
    vec = vec.at[:D_H1, 0].set(bs[0])
    vec = vec.at[:D_H2, 1].set(bs[1])
    vec = vec.at[:D_H3, 2].set(bs[2])
    vec = vec.at[:D_OUT, 3].set(bs[3])
    vec = vec.at[:D_OUT, 4].set(scales[3])          # post-softmax BN scale
    vec = vec.at[:D_OUT, 5].set(shifts[3])          # post-softmax BN shift

    ws_bf16 = [w.astype(jnp.bfloat16) for w in ws]  # bf16 weights (MXU-native, half HBM)
    return ws_bf16, vec


def reference_forward(x, raw, eps=1e-5):
    """Pure-JAX f32 reference matching the PyTorch module in eval mode."""
    h = x
    for i, (w, b, g, be, m, v) in enumerate(raw):
        h = h @ w.T + b
        h = jnp.tanh(h) if i < 3 else jax.nn.softmax(h, axis=1)
        h = (h - m) / jnp.sqrt(v + eps) * g + be    # BatchNorm1d (eval)
    return h


if __name__ == "__main__":
    key = jax.random.PRNGKey(0)
    key, kx = jax.random.split(key)
    N = 8
    x = jax.random.normal(kx, (N, D_IN), jnp.float32)

    raw_params = make_params(key)
    (w1, w2, w3, w4), vec = prepare_params(raw_params)

    out = jax.block_until_ready(location_mlp(x, w1, w2, w3, w4, vec))
    ref = reference_forward(x, raw_params)

    assert out.shape == (N, D_OUT)
    # Matmul operands (and tanh on v6e/v7x) are bf16, so compare against the f32
    # reference with a correspondingly (deliberately) looser tolerance.
    assert jnp.allclose(out, ref, atol=5e-2, rtol=5e-2), float(jnp.max(jnp.abs(out - ref)))

    print("KERNEL_OK")
</pallas_src>

<mosaic_0001>
module attributes {stable_mosaic.version = 11 : i64} {
  func.func @_location_mlp_kernel(%arg0: i32, %arg1: memref<12x128xbf16, #tpu.memory_space<vmem>>, %arg2: memref<57x12xbf16, #tpu.memory_space<vmem>>, %arg3: memref<35x57xbf16, #tpu.memory_space<vmem>>, %arg4: memref<35x35xbf16, #tpu.memory_space<vmem>>, %arg5: memref<3x35xbf16, #tpu.memory_space<vmem>>, %arg6: memref<64x8xf32, #tpu.memory_space<vmem>>, %arg7: memref<3x128xf32, #tpu.memory_space<vmem>>) attributes {dimension_semantics = [#tpu.dimension_semantics<parallel>], iteration_bounds = array<i64: 2>, scalar_prefetch = 0 : i64, scratch_operands = 0 : i64, tpu.core_type = #tpu.core_type<tc>, window_params = [{transform_indices = @transform_0, window_bounds = array<i64: 12, 128>}, {pipeline_mode = #tpu.pipeline_mode<synchronous>, transform_indices = @transform_1, window_bounds = array<i64: 57, 12>}, {pipeline_mode = #tpu.pipeline_mode<synchronous>, transform_indices = @transform_2, window_bounds = array<i64: 35, 57>}, {pipeline_mode = #tpu.pipeline_mode<synchronous>, transform_indices = @transform_3, window_bounds = array<i64: 35, 35>}, {pipeline_mode = #tpu.pipeline_mode<synchronous>, transform_indices = @transform_4, window_bounds = array<i64: 3, 35>}, {pipeline_mode = #tpu.pipeline_mode<synchronous>, transform_indices = @transform_5, window_bounds = array<i64: 64, 8>}, {transform_indices = @transform_6, window_bounds = array<i64: 3, 128>}]} {
    %c0 = arith.constant 0 : index
    %c0_0 = arith.constant 0 : index
    %0 = vector.load %arg1[%c0, %c0_0] : memref<12x128xbf16, #tpu.memory_space<vmem>>, vector<12x128xbf16>
    %c0_1 = arith.constant 0 : index
    %c0_2 = arith.constant 0 : index
    %1 = vector.load %arg6[%c0_1, %c0_2] : memref<64x8xf32, #tpu.memory_space<vmem>>, vector<64x8xf32>
    %2 = vector.extract_strided_slice %1 {offsets = [0, 0], sizes = [57, 1], strides = [1, 1]} : vector<64x8xf32> to vector<57x1xf32>
    %3 = vector.extract_strided_slice %1 {offsets = [0, 1], sizes = [35, 1], strides = [1, 1]} : vector<64x8xf32> to vector<35x1xf32>
    %4 = vector.extract_strided_slice %1 {offsets = [0, 2], sizes = [35, 1], strides = [1, 1]} : vector<64x8xf32> to vector<35x1xf32>
    %5 = vector.extract_strided_slice %1 {offsets = [0, 3], sizes = [3, 1], strides = [1, 1]} : vector<64x8xf32> to vector<3x1xf32>
    %6 = vector.extract_strided_slice %1 {offsets = [0, 4], sizes = [3, 1], strides = [1, 1]} : vector<64x8xf32> to vector<3x1xf32>
    %7 = vector.extract_strided_slice %1 {offsets = [0, 5], sizes = [3, 1], strides = [1, 1]} : vector<64x8xf32> to vector<3x1xf32>
    %c0_3 = arith.constant 0 : index
    %c0_4 = arith.constant 0 : index
    %8 = vector.load %arg2[%c0_3, %c0_4] : memref<57x12xbf16, #tpu.memory_space<vmem>>, vector<57x12xbf16>
    %cst = arith.constant dense<0.000000e+00> : vector<57x128xf32>
    %9 = tpu.matmul %8, %0, %cst {dimension_numbers = #tpu.dot_dimension_numbers<[1], [0], [0], [1], [0, 0, 1, 1], [], []>} : vector<57x12xbf16>, vector<12x128xbf16>, vector<57x128xf32> -> vector<57x128xf32>
    %10 = vector.broadcast %2 : vector<57x1xf32> to vector<57x128xf32>
    %11 = arith.addf %9, %10 : vector<57x128xf32>
    %12 = arith.truncf %11 : vector<57x128xf32> to vector<57x128xbf16>
    %13 = math.tanh %12 : vector<57x128xbf16>
    %c0_5 = arith.constant 0 : index
    %c0_6 = arith.constant 0 : index
    %14 = vector.load %arg3[%c0_5, %c0_6] : memref<35x57xbf16, #tpu.memory_space<vmem>>, vector<35x57xbf16>
    %cst_7 = arith.constant dense<0.000000e+00> : vector<35x128xf32>
    %15 = tpu.matmul %14, %13, %cst_7 {dimension_numbers = #tpu.dot_dimension_numbers<[1], [0], [0], [1], [0, 0, 1, 1], [], []>} : vector<35x57xbf16>, vector<57x128xbf16>, vector<35x128xf32> -> vector<35x128xf32>
    %16 = vector.broadcast %3 : vector<35x1xf32> to vector<35x128xf32>
    %17 = arith.addf %15, %16 : vector<35x128xf32>
    %18 = arith.truncf %17 : vector<35x128xf32> to vector<35x128xbf16>
    %19 = math.tanh %18 : vector<35x128xbf16>
    %c0_8 = arith.constant 0 : index
    %c0_9 = arith.constant 0 : index
    %20 = vector.load %arg4[%c0_8, %c0_9] : memref<35x35xbf16, #tpu.memory_space<vmem>>, vector<35x35xbf16>
    %cst_10 = arith.constant dense<0.000000e+00> : vector<35x128xf32>
    %21 = tpu.matmul %20, %19, %cst_10 {dimension_numbers = #tpu.dot_dimension_numbers<[1], [0], [0], [1], [0, 0, 1, 1], [], []>} : vector<35x35xbf16>, vector<35x128xbf16>, vector<35x128xf32> -> vector<35x128xf32>
    %22 = vector.broadcast %4 : vector<35x1xf32> to vector<35x128xf32>
    %23 = arith.addf %21, %22 : vector<35x128xf32>
    %24 = arith.truncf %23 : vector<35x128xf32> to vector<35x128xbf16>
    %25 = math.tanh %24 : vector<35x128xbf16>
    %c0_11 = arith.constant 0 : index
    %c0_12 = arith.constant 0 : index
    %26 = vector.load %arg5[%c0_11, %c0_12] : memref<3x35xbf16, #tpu.memory_space<vmem>>, vector<3x35xbf16>
    %cst_13 = arith.constant dense<0.000000e+00> : vector<3x128xf32>
    %27 = tpu.matmul %26, %25, %cst_13 {dimension_numbers = #tpu.dot_dimension_numbers<[1], [0], [0], [1], [0, 0, 1, 1], [], []>} : vector<3x35xbf16>, vector<35x128xbf16>, vector<3x128xf32> -> vector<3x128xf32>
    %28 = vector.broadcast %5 : vector<3x1xf32> to vector<3x128xf32>
    %29 = arith.addf %27, %28 : vector<3x128xf32>
    %cst_14 = arith.constant dense<0xFF800000> : vector<128xf32>
    %30 = vector.multi_reduction <maximumf>, %29, %cst_14 [0] : vector<3x128xf32> to vector<128xf32>
    %31 = vector.shape_cast %30 : vector<128xf32> to vector<1x128xf32>
    %32 = vector.broadcast %31 : vector<1x128xf32> to vector<3x128xf32>
    %33 = arith.subf %29, %32 : vector<3x128xf32>
    %34 = math.exp %33 : vector<3x128xf32>
    %cst_15 = arith.constant dense<0.000000e+00> : vector<128xf32>
    %35 = vector.multi_reduction <add>, %34, %cst_15 [0] : vector<3x128xf32> to vector<128xf32>
    %36 = vector.shape_cast %35 : vector<128xf32> to vector<1x128xf32>
    %37 = tpu.reciprocal %36 {approx = true} : vector<1x128xf32> -> vector<1x128xf32>
    %38 = vector.broadcast %37 : vector<1x128xf32> to vector<3x128xf32>
    %39 = arith.mulf %34, %38 : vector<3x128xf32>
    %40 = vector.broadcast %6 : vector<3x1xf32> to vector<3x128xf32>
    %41 = arith.mulf %39, %40 : vector<3x128xf32>
    %42 = vector.broadcast %7 : vector<3x1xf32> to vector<3x128xf32>
    %43 = arith.addf %41, %42 : vector<3x128xf32>
    %c0_16 = arith.constant 0 : index
    %c0_17 = arith.constant 0 : index
    %44 = vector.load %arg7[%c0_16, %c0_17] : memref<3x128xf32, #tpu.memory_space<vmem>>, vector<3x128xf32>
    tpu.vector_store %arg7[%c0_16, %c0_17], %43 {strides = array<i32>} : memref<3x128xf32, #tpu.memory_space<vmem>>, vector<3x128xf32>,
    return
  }
  func.func @transform_0(%arg0: i32) -> (i32, i32) {
    %c0_i32 = arith.constant 0 : i32
    %c0_i32_0 = arith.constant 0 : i32
    return %c0_i32, %arg0 : i32, i32
  }
  func.func @transform_1(%arg0: i32) -> (i32, i32) {
    %c0_i32 = arith.constant 0 : i32
    %c0_i32_0 = arith.constant 0 : i32
    %c0_i32_1 = arith.constant 0 : i32
    return %c0_i32, %c0_i32_0 : i32, i32
  }
  func.func @transform_2(%arg0: i32) -> (i32, i32) {
    %c0_i32 = arith.constant 0 : i32
    %c0_i32_0 = arith.constant 0 : i32
    %c0_i32_1 = arith.constant 0 : i32
    return %c0_i32, %c0_i32_0 : i32, i32
  }
  func.func @transform_3(%arg0: i32) -> (i32, i32) {
    %c0_i32 = arith.constant 0 : i32
    %c0_i32_0 = arith.constant 0 : i32
    %c0_i32_1 = arith.constant 0 : i32
    return %c0_i32, %c0_i32_0 : i32, i32
  }
  func.func @transform_4(%arg0: i32) -> (i32, i32) {
    %c0_i32 = arith.constant 0 : i32
    %c0_i32_0 = arith.constant 0 : i32
    %c0_i32_1 = arith.constant 0 : i32
    return %c0_i32, %c0_i32_0 : i32, i32
  }
  func.func @transform_5(%arg0: i32) -> (i32, i32) {
    %c0_i32 = arith.constant 0 : i32
    %c0_i32_0 = arith.constant 0 : i32
    %c0_i32_1 = arith.constant 0 : i32
    return %c0_i32, %c0_i32_0 : i32, i32
  }
  func.func @transform_6(%arg0: i32) -> (i32, i32) {
    %c0_i32 = arith.constant 0 : i32
    %c0_i32_0 = arith.constant 0 : i32
    return %c0_i32, %arg0 : i32, i32
  }
}

</mosaic_0001>

<bundles_post_ra>
// kernel: _location_mlp_impl.1
= control target key start
LH: loop header
LB: loop body
LE: loop exit
PB: predicated region body
PF: predicated region fallthrough
CT: control target
= control target key end

     0   :  { %s1921_s0 = inlined_call_operand.hbm [shape: bf16[12,256], index: 0, kind: input, shape index: {}]   ;;  %s1922_s1 = inlined_call_operand.hbm [shape: bf16[57,12], index: 1, kind: input, shape index: {}]   ;;  %s1923_s2 = inlined_call_operand.hbm [shape: bf16[35,57], index: 2, kind: input, shape index: {}]   ;;  %s1924_s3 = inlined_call_operand.hbm [shape: bf16[35,35], index: 3, kind: input, shape index: {}]   ;;  %s1925_s4 = inlined_call_operand.hbm [shape: bf16[3,35], index: 4, kind: input, shape index: {}]   ;;  %s1926_s5 = inlined_call_operand.hbm [shape: f32[64,8], index: 5, kind: input, shape index: {}]   ;;  %s1927_s6 = inlined_call_operand.hbm [shape: f32[3,256], index: 6, kind: output, shape index: {}]  }
   0x1   :  { %1931 = sst [smem:[#allocation19_spill]] %s1922_s1 }
   0x2   :  { %11 = vsyncpa [#allocation3], 0 }
   0x3   :  { %13 = vsyncpa [#allocation3 + $0x1], 0 }
   0x4   :  { %14 = vsyncpa [#allocation6], 0 }
   0x5   :  { %15 = vsyncpa [#allocation9], 0 }
   0x6   :  { %16 = vsyncpa [#allocation12], 0 }
   0x7   :  { %17 = vsyncpa [#allocation4], 0 }
   0x8   :  { %19 = vsyncpa [#allocation4 + $0x1], 0  ;;  %s1547_s21 = smov 0   ;;  %s1549_s22 = smov 0  }
   0x9   :  { %s1551_s23 = smov 0   ;;  %s1553_s24 = smov 0  }
   0xa LB: > { %s1568_s25 = sadd.s32 4294967295, %s1490_s24   ;;  %s962_s26 = sadd.s32 4294967294, %s1490_s24   ;;  %s1490_s24 = sphi %s1553_s24, %s1954_s24   ;;  %s1486_s23 = sphi %s1551_s23, %s1953_s23   ;;  %s1482_s22 = sphi %s1549_s22, %s1952_s22   ;;  %s1478_s21 = sphi %s1547_s21, %s1951_s21  }
   0xb   : > { %p45_p0 = scmp.ne.s32.totalorder %s1482_s22, %s1478_s21  ;;  %p1928_p1 = scmp.eq.s32.totalorder %s1568_s25, 0 }
   0xc   : > { %p180_p3 = scmp.eq.s32.totalorder %s962_s26, 1  ;;  %p963_p5 = scmp.ge.s32.totalorder %s1490_s24, 1 }
   0xd   : > { %p1577_p4 = por %p1928_p1, %p45_p0  ;;  %p187_p7 = scmp.lt.s32.totalorder %s1490_s24, 3 }
   0xe   : > { %p1582_p6 = por %p180_p3, %p45_p0  ;;  %s1492_s30 = smov [#allocation5]  }
   0xf   : > { %s1932_s27 = scalar_select %p1577_p4, 1, 0 }
  0x10   : > { %s1933_s28 = scalar_select %p1582_p6, 1, 0 }
  0x11   : > { %p1587_p8 = pnand %p963_p5, %p187_p7  ;;  %s199_s7 = sshll.u32 %s1492_s30, 4  ;;  %s1591_s7 = int_to_ptr.vmem [resolvable:$true] %s199_s7 }
  0x12   : > { %s1493_s9 = smov [#allocation8]   ;;  %s1494_s11 = smov [#allocation7]  }
  0x13   : > { %s1934_s29 = scalar_select %p1587_p8, 1, 0 }
  0x14   : > { %p1111_p9 = pneg %p1587_p8  ;;  %s225_s10 = sshll.u32 %s1493_s9, 4  ;;  %s1602_s10 = int_to_ptr.vmem [resolvable:$true] %s225_s10 }
  0x15   : > { %s1604_s12 = sshll.u32 %s1494_s11, 4  ;;  %s1936_s1 = sld [smem:[#allocation19_spill]]  ;;  %s213_s12 = int_to_ptr.vmem [resolvable:$true] %s1604_s12 }
  0x16   : > { %p1598_p11 = pnand %p1111_p9, %p1928_p1 }
  0x18   : > { %p1614_p13 = pneg %p1598_p11 }
  0x1b   : > { %s1242_s15 = scalar_lea.hbm %s1936_s1, 512 }
  0x1c   : > { %p1243_p12 = scmp.ne.s32.totalorder %s1936_s1, %s1242_s15  ;;  %p1249_p5 = scmp.lt.u32.totalorder %s1242_s15, %s1936_s1 }
  0x1e   : > { %p1245_p0 = pnand %p1614_p13, %p1243_p12 }
  0x20   : > { %p1246_p3 = pneg %p1245_p0 }
  0x22   : > { %p1251_p7 = pnand %p1249_p5, %p1246_p3 }
  0x24   : > { %1254 = shalt.err (!%p1251_p7)
}
  0x25   : > { %s1255_s26 = scalar_lea.vmem %s1591_s7, 512  ;;  %p1263_p2 = scmp.lt.s32.totalorder %s1591_s7, %s1591_s7 }
  0x26   : > { %p1256_p9 = scmp.ne.s32.totalorder %s1591_s7, %s1255_s26  ;;  %p1264_p6 = scmp.lt.s32.totalorder %s1255_s26, %s1255_s26 }
  0x28   : > { %p1258_p10 = pnand %p1256_p9, %p1614_p13  ;;  %p1265_p12 = por %p1264_p6, %p1263_p2 }
  0x2a   : > { %p1259_p1 = pneg %p1258_p10 }
  0x2c   : > { %p1266_p0 = pnand %p1265_p12, %p1259_p1 }
  0x2e   : > { %1269 = shalt.err (!%p1266_p0)
}
  0x2f   : > { %s1495_s30 = smov 64   ;;  %s1496_s9 = smov 4  }
  0x30   : > { %1114 = dma.hbm_to_vmem [thread:$0]  (!%p1598_p11), %s1936_s1, 512, %s1591_s7, [#allocation6], %s1495_s30, %s1495_s30, %s1496_s9  }
  0x31   : > { %s1270_s16 = scalar_lea.hbm %s1924_s3, 320 }
  0x32   : > { %p1271_p1 = scmp.ne.s32.totalorder %s1924_s3, %s1270_s16  ;;  %p1277_p10 = scmp.lt.u32.totalorder %s1270_s16, %s1924_s3 }
  0x34   : > { %p1273_p2 = pnand %p1271_p1, %p1614_p13 }
  0x36   : > { %p1274_p6 = pneg %p1273_p2 }
  0x38   : > { %p1279_p3 = pnand %p1277_p10, %p1274_p6 }
  0x3a   : > { %1282 = shalt.err (!%p1279_p3)
}
  0x3b   : > { %s1283_s7 = scalar_lea.vmem %s1602_s10, 320  ;;  %p1291_p12 = scmp.lt.s32.totalorder %s1602_s10, %s1602_s10 }
  0x3c   : > { %p1284_p5 = scmp.ne.s32.totalorder %s1602_s10, %s1283_s7  ;;  %p1292_p0 = scmp.lt.s32.totalorder %s1283_s7, %s1283_s7 }
  0x3e   : > { %p1286_p7 = pnand %p1284_p5, %p1614_p13  ;;  %p1293_p1 = por %p1292_p0, %p1291_p12 }
  0x40   : > { %p1287_p9 = pneg %p1286_p7 }
  0x42   : > { %p1294_p2 = pnand %p1293_p1, %p1287_p9 }
  0x44   : > { %1297 = shalt.err (!%p1294_p2)
}
  0x45   : > { %1120 = dma.hbm_to_vmem [thread:$0]  (!%p1598_p11), %s1924_s3, 320, %s1602_s10, [#allocation9], %s1495_s30, %s1495_s30, %s1496_s9  }
  0x46   : > { %s1298_s16 = scalar_lea.hbm %s1923_s2, 320 }
  0x47   : > { %p1299_p6 = scmp.ne.s32.totalorder %s1923_s2, %s1298_s16  ;;  %p1305_p5 = scmp.lt.u32.totalorder %s1298_s16, %s1923_s2 }
  0x49   : > { %p1301_p10 = pnand %p1299_p6, %p1614_p13 }
  0x4b   : > { %p1302_p3 = pneg %p1301_p10 }
  0x4d   : > { %p1307_p7 = pnand %p1305_p5, %p1302_p3 }
  0x4f   : > { %1310 = shalt.err (!%p1307_p7)
}
  0x50   : > { %s1311_s7 = scalar_lea.vmem %s213_s12, 320  ;;  %p1319_p1 = scmp.lt.s32.totalorder %s213_s12, %s213_s12 }
  0x51   : > { %p1312_p9 = scmp.ne.s32.totalorder %s213_s12, %s1311_s7  ;;  %p1320_p2 = scmp.lt.s32.totalorder %s1311_s7, %s1311_s7 }
  0x53   : > { %p1314_p12 = pnand %p1312_p9, %p1614_p13  ;;  %p1321_p4 = por %p1320_p2, %p1319_p1 }
  0x55   : > { %p1315_p0 = pneg %p1314_p12 }
  0x57   : > { %p1322_p8 = pnand %p1321_p4, %p1315_p0 }
  0x59   : > { %1325 = shalt.err (!%p1322_p8)
}
  0x5a   : > { %1117 = dma.hbm_to_vmem [thread:$0]  (!%p1598_p11), %s1923_s2, 320, %s213_s12, [#allocation6], %s1495_s30, %s1495_s30, %s1496_s9  }
  0x5b   : > { %s1497_s13 = smov [#allocation10]   ;;  %s1498_s15 = smov [#allocation11]  }
  0x5c   : > { %s239_s14 = sshll.u32 %s1497_s13, 4  ;;  %s249_s16 = sshll.u32 %s1498_s15, 4  ;;  %s240_s14 = int_to_ptr.vmem [resolvable:$true] %s239_s14  ;;  %s250_s16 = int_to_ptr.vmem [resolvable:$true] %s249_s16 }
  0x5d   : > { %s1326_s20 = scalar_lea.hbm %s1925_s4, 32 }
  0x5e   : > { %p1327_p4 = scmp.ne.s32.totalorder %s1925_s4, %s1326_s20  ;;  %p1333_p10 = scmp.lt.u32.totalorder %s1326_s20, %s1925_s4 }
  0x60   : > { %p1329_p8 = pnand %p1327_p4, %p1614_p13 }
  0x62   : > { %p1330_p6 = pneg %p1329_p8 }
  0x64   : > { %p1335_p3 = pnand %p1333_p10, %p1330_p6 }
  0x66   : > { %1338 = shalt.err (!%p1335_p3)
}
  0x67   : > { %s1339_s12 = scalar_lea.vmem %s240_s14, 32  ;;  %p1347_p12 = scmp.lt.s32.totalorder %s240_s14, %s240_s14 }
  0x68   : > { %p1340_p5 = scmp.ne.s32.totalorder %s240_s14, %s1339_s12  ;;  %p1348_p0 = scmp.lt.s32.totalorder %s1339_s12, %s1339_s12 }
  0x6a   : > { %p1342_p7 = pnand %p1340_p5, %p1614_p13  ;;  %p1349_p1 = por %p1348_p0, %p1347_p12 }
  0x6c   : > { %p1343_p9 = pneg %p1342_p7 }
  0x6e   : > { %p1350_p2 = pnand %p1349_p1, %p1343_p9 }
  0x70   : > { %1353 = shalt.err (!%p1350_p2)
}
  0x71   : > { %1123 = dma.hbm_to_vmem [thread:$0]  (!%p1598_p11), %s1925_s4, 32, %s240_s14, [#allocation9]  }
  0x72   : > { %s1354_s17 = scalar_lea.hbm %s1926_s5, 1024 }
  0x73   : > { %p1355_p4 = scmp.ne.s32.totalorder %s1926_s5, %s1354_s17  ;;  %p1361_p10 = scmp.lt.u32.totalorder %s1354_s17, %s1926_s5 }
  0x75   : > { %p1357_p8 = pnand %p1355_p4, %p1614_p13 }
  0x77   : > { %p1358_p6 = pneg %p1357_p8 }
  0x79   : > { %p1363_p3 = pnand %p1361_p10, %p1358_p6 }
  0x7b   : > { %1366 = shalt.err (!%p1363_p3)
}
  0x7c   : > { %s1367_s10 = scalar_lea.vmem %s250_s16, 1024  ;;  %p1375_p12 = scmp.lt.s32.totalorder %s250_s16, %s250_s16 }
  0x7d   : > { %p1368_p5 = scmp.ne.s32.totalorder %s250_s16, %s1367_s10  ;;  %p1376_p0 = scmp.lt.s32.totalorder %s1367_s10, %s1367_s10 }
  0x7f   : > { %p1370_p7 = pnand %p1368_p5, %p1614_p13  ;;  %p1377_p1 = por %p1376_p0, %p1375_p12 }
  0x81   : > { %p1371_p9 = pneg %p1370_p7 }
  0x83   : > { %p1378_p2 = pnand %p1377_p1, %p1371_p9 }
  0x85   : > { %1381 = shalt.err (!%p1378_p2)
}
  0x86   : > { %s1499_s14 = smov 128   ;;  %s1500_s18 = smov 8  }
  0x87   : > { %1126 = dma.hbm_to_vmem [thread:$0]  (!%p1598_p11), %s1926_s5, 1024, %s250_s16, [#allocation12], %s1499_s14, %s1499_s14, %s1500_s18  }
  0x88   : > { %s1725_s13 = sadd.s32 1, %s1490_s24   ;;  %s32_s15 = sadd.s32 1, %s1486_s23 }
  0x89   : > { %s29_s1 = ssub.s32 %s1490_s24, %s1725_s13  ;;  %p39_p4 = scmp.ne.s32.totalorder %s1486_s23, %s1482_s22 }
  0x8a   : > { %p30_p13 = scmp.eq.s32.totalorder %s29_s1, 0  ;;  %p40_p8 = scmp.eq.s32.totalorder %s1490_s24, 0 }
  0x8b   : > { %p1140_p6 = scmp.lt.s32.totalorder %s1490_s24, 2  ;;  %p1938_p3 = scmp.eq.s32.totalorder %s1568_s25, 1 }
  0x8c   : > { %s1735_s17 = scalar_select %p30_p13, %s1486_s23, %s32_s15  }
  0x8d   : > { %p41_p10 = por %p40_p8, %p39_p4  ;;  %p1739_p5 = por %p1938_p3, %p39_p4 }
  0x8e   : > { %s263_s19 = sand.u32 1, %s1486_s23   ;;  %s971_s20 = sshll.u32 %s1490_s24, 6 }
  0x8f   : > { %s970_s16 = sshll.u32 %s263_s19, 3  ;;  %s1748_s10 = scalar_lea.hbm %s1921_s0, %s971_s20 }
  0x90   : > { %s267_s18 = scalar_lea.vmem [#allocation2], %s970_s16  ;;  %p1750_p11 = pnand %p1140_p6, %p41_p10 }
  0x91   : > { %s273_s12 = sshll.u32 %s267_s18, 4  ;;  %s1756_s1 = scalar_lea.sflag [#allocation3], %s263_s19  ;;  %s1754_s12 = int_to_ptr.vmem [resolvable:$true] %s273_s12 }
  0x92   : > { %s1382_s15 = scalar_lea.hbm %s1748_s10, 128  ;;  %p1384_p9 = pneg %p1750_p11 }
  0x93   : > { %p1383_p7 = scmp.ne.s32.totalorder %s1748_s10, %s1382_s15  ;;  %s1387_s26 = scalar_lea.hbm %s1921_s0, 256 }
  0x94   : > { %p1388_p1 = scmp.lt.u32.totalorder %s1748_s10, %s1921_s0  ;;  %p1389_p2 = scmp.lt.u32.totalorder %s1387_s26, %s1382_s15 }
  0x95   : > { %p1385_p12 = pnand %p1384_p9, %p1383_p7  ;;  %p1391_p4 = scmp.lt.u32.totalorder %s1382_s15, %s1748_s10 }
  0x96   : > { %p1390_p13 = por %p1389_p2, %p1388_p1 }
  0x97   : > { %p1386_p0 = pneg %p1385_p12 }
  0x98   : > { %p1392_p8 = por %p1391_p4, %p1390_p13 }
  0x9a   : > { %p1393_p6 = pnand %p1392_p8, %p1386_p0 }
  0x9c   : > { %1396 = shalt.err (!%p1393_p6)
}
  0x9d   : > { %s1397_s19 = scalar_lea.vmem %s1754_s12, 128  ;;  %s1501_s20 = smov [#allocation2]  }
  0x9e   : > { %p1398_p10 = scmp.ne.s32.totalorder %s1754_s12, %s1397_s19  ;;  %s1402_s16 = sshll.u32 %s1501_s20, 4  ;;  %s1403_s16 = int_to_ptr.vmem [resolvable:$false] %s1402_s16 }
  0x9f   : > { %s1404_s7 = scalar_lea.vmem %s1403_s16, 256  ;;  %p1405_p12 = scmp.lt.s32.totalorder %s1754_s12, %s1403_s16 }
  0xa0   : > { %p1400_p3 = pnand %p1398_p10, %p1384_p9  ;;  %p1406_p1 = scmp.lt.s32.totalorder %s1404_s7, %s1397_s19 }
  0xa2   : > { %p1401_p7 = pneg %p1400_p3  ;;  %p1407_p2 = por %p1406_p1, %p1405_p12 }
  0xa4   : > { %p1408_p13 = pnand %p1407_p2, %p1401_p7 }
  0xa6   : > { %1411 = shalt.err (!%p1408_p13)
}
  0xa7   : > { %1130 = dma.hbm_to_vmem [thread:$0]  (!%p1750_p11), %s1748_s10, 128, %s1754_s12, %s1756_s1, %s1499_s14, %s1495_s30, %s1496_s9  }
  0xa8   : > { %p1941_p9 = scmp.ne.s32.totalorder %s1934_s29, 0 }
  0xa9   : > { %s1790_s15 = sand.u32 (!%p1941_p9), 1, %s1482_s22   ;;  %p1942_p0 = scmp.ne.s32.totalorder (!%p1941_p9), %s1932_s27, 0 }
  0xaa   : > { %285 = sbr.rel (%p1941_p9) target bundleno = 1223 (0x4c7), region = 44  ;;  %s973_s26 = sshll.u32 (!%p1941_p9), %s1790_s15, 3 }
  0xab   : > { %s288_s18 = scalar_lea.sflag (!%p1941_p9), [#allocation3], %s1790_s15  ;;  %s291_s19 = scalar_lea.vmem (!%p1941_p9), [#allocation2], %s973_s26 }
  0xb1   : > { %1457 = dma.done.wait (%p1942_p0), %s288_s18, 128  }
  0xb2   : > { %1459 = vsyncadd (%p1942_p0), %s288_s18, 4294967168  ;;  %p1943_p4 = scmp.eq.s32.totalorder %s1568_s25, 0 }
  0xb4   : > { %1461 = dma.done.wait (%p1943_p4), [#allocation6], 832   ;;  %p1944_p11 = pmov %p1943_p4 }
  0xb5   : > { %p1945_p8 = pmov %p1943_p4 }
  0xb6   : > { %1463 = vsyncadd (%p1944_p11), [#allocation6], 4294966464 }
  0xb7   : > { %1465 = dma.done.wait (%p1945_p8), [#allocation9], 352   ;;  %p1946_p6 = pmov %p1943_p4 }
  0xb8   : > { %p1947_p10 = pmov %p1943_p4 }
  0xb9   : > { %1467 = vsyncadd (%p1946_p6), [#allocation9], 4294966944 }
  0xba   : > { %1469 = dma.done.wait (%p1947_p10), [#allocation12], 1024   ;;  %p1948_p3 = pmov %p1943_p4 }
  0xbb   : > { %v1502_v0 = vmov 0   ;;  %vm437_vm0 = vcmask 1045504   ;;  %vm424_vm1 = vcmask 97280   ;;  %v1207_v1 = vld [vmem:[%s291_s19] sm:$0x3f]   ;;  %v1208_v2 = vld [vmem:[#allocation5] sm:$0xff]  }
  0xbc   : > { %1471 = vsyncadd (%p1948_p3), [#allocation12], 4294966272  ;;  %1197 = vset.pattern.permute.xlu0 %v1502_v0  ;;  %1198 = vset.pattern.permute.xlu1 %v1502_v0  ;;  %v439_v3 = vsel %vm437_vm0, %v1207_v1, 0  ;;  %v1209_v4 = vld [vmem:[#allocation5 + $0x8] sm:$0xff]   ;;  %v1210_v5 = vld [vmem:[#allocation5 + $0x10] sm:$0xff]   ;;  %v1503_v15 = vmov 0.0  }
  0xbd   : > { %1086 = vmatprep.subr.msk.bf16.mxu0 %vm437_vm0, %v1207_v1  ;;  %1030 = vmatprep.mubr.msk.bf16.mxu0 %vm424_vm1, %v1208_v2  ;;  %v1811_v6 = vld [vmem:[#allocation11] sm:$0xff]  ;;  %v1813_v7 = vld [vmem:[#allocation11 + $0x10] sm:$0xff]  ;;  %v1819_v8 = vld [vmem:[#allocation11 + $0x8] sm:$0xff]  ;;  %vm1504_vm2 = vmmov 0   ;;  %v1505_v16 = vmov 1   ;;  %vm562_vm3 = vcmask 1043456  }
  0xbe   : > { %1029 = vmatpush3.bf16.msra.mxu0 %v439_v3  ;;  %361 = vperm.xlu0 %1197, %v1811_v6   ;;  %v1821_v9 = vld [vmem:[#allocation11 + $0x18] sm:$0xff]  ;;  %v1211_v10 = vld [vmem:[#allocation5 + $0x18] sm:$0x1f]   ;;  %v1825_v11 = vld [vmem:[#allocation11 + $0x20] sm:$0xff]  ;;  %vm563_vm4 = vcmask 1044480   ;;  %v1506_v47 = vmov 65535  }
  0xbf   : > { %371 = vperm.xlu1 %1198, %v1813_v7   ;;  %v348_v12 = vld [vmem:[#allocation11 + $0x28] sm:$0xff]  ;;  %v349_v13 = vld [vmem:[#allocation11 + $0x30] sm:$0xff]  ;;  %v350_v14 = vld [vmem:[#allocation11 + $0x38] sm:$0xff]  ;;  %1038 = vmatprep.subr.bf16.mxu1 %v1503_v15  ;;  %v564_v48 = vsel %vm562_vm3, 4294967295, %v1506_v47  ;;  %vm552_vm5 = vcmask 465920   ;;  %v1507_v56 = vmov 2  }
  0xc0   : > { %1058 = vmatprep.subr.bf16.mxu0 %v1503_v15  ;;  %1046 = vmatprep.mubr.msk.bf16.mxu1 %vm1504_vm2, %v1503_v15  ;;  %v565_v51 = vsel %vm563_vm4, %v564_v48, 0  ;;  %v1212_v53 = vld [vmem:[#allocation7] sm:$0xff]   ;;  %v1213_v54 = vld [vmem:[#allocation7 + $0x8] sm:$0xff]   ;;  %v1214_v55 = vld [vmem:[#allocation7 + $0x10] ss:$0 sps:$4 sm:$0x33]  }
  0xc1   : > { %1031 = vmatmul.mubr.msk.bf16.vlgmr.msra.gmra.mrb[0].mxu0 %vm424_vm1, %v1209_v4  ;;  %vm679_vm6 = vcmask 1040384   ;;  %vm680_vm7 = vcmask 1041408   ;;  %vm669_vm8 = vcmask 285696   ;;  %vm799_vm9 = vcmask 1042432   ;;  %s979_s27 = sshll.u32 %s1790_s15, 2  ;;  %s1003_s29 = sshll.u32 %s1568_s25, 6 }
  0xc2   : > { %1034 = vmatprep.mubr.msk.bf16.mxu0 %vm424_vm1, %v1210_v5  ;;  %366 = vperm.xlu0 %1197, %v1819_v8   ;;  %s339_s30 = scalar_lea.vmem [#allocation13], %s979_s27  ;;  %s1877_s12 = scalar_lea.hbm %s1927_s6, %s1003_s29 }
  0xc3   : > { %376 = vperm.xlu1 %1198, %v1821_v9   ;;  %s844_s9 = sshll.u32 %s339_s30, 4  ;;  %s831_s11 = scalar_lea.sflag [#allocation4], %s1790_s15  ;;  %s1879_s9 = int_to_ptr.vmem [resolvable:$true] %s844_s9 }
  0xc4   : > { %s1412_s1 = scalar_lea.vmem %s1879_s9, 64  ;;  %s1511_s25 = smov [#allocation13]  }
  0xc5   : > { %p1413_p7 = scmp.ne.s32.totalorder %s1879_s9, %s1412_s1  ;;  %s1416_s20 = sshll.u32 %s1511_s25, 4  ;;  %s1417_s20 = int_to_ptr.vmem [resolvable:$false] %s1416_s20 }
  0xc6   : > { %381 = vperm.xlu0 %1197, %v1825_v11   ;;  %s1418_s16 = scalar_lea.vmem %s1417_s20, 128  ;;  %p1419_p2 = scmp.lt.s32.totalorder %s1879_s9, %s1417_s20 }
  0xc7   : > { %386 = vperm.xlu1 %1198, %v348_v12   ;;  %p1414_p12 = pnand %p1413_p7, %p1739_p5  ;;  %p1420_p13 = scmp.lt.s32.totalorder %s1418_s16, %s1412_s1 }
  0xc9   : > { %1035 = vmatmul.mubr.msk.bf16.gmra.mrb[4].mxu0 %vm424_vm1, %v1211_v10  ;;  %p1415_p1 = pneg %p1414_p12  ;;  %p1421_p9 = por %p1420_p13, %p1419_p2 }
  0xca   : > { %391 = vperm.xlu0 %1197, %v349_v13   ;;  %1064 = vmatprep.mubr.msk.bf16.mxu0 %vm1504_vm2, %v1503_v15 }
  0xcb   : > { %396 = vperm.xlu1 %1198, %v350_v14   ;;  %p1422_p0 = pnand %p1421_p9, %p1415_p1 }
  0xce   : > { %1199 = vset.pattern.permute.xlu0 %v1505_v16 }
  0xcf   : > { %1200 = vset.pattern.permute.xlu1 %v1505_v16  ;;  %520 = vperm.xlu0 %1199, %v1811_v6  }
  0xd0   : > { %524 = vperm.xlu1 %1200, %v1819_v8  }
  0xd3   : > { %532 = vperm.xlu0 %1199, %v1821_v9  }
  0xd4   : > { %528 = vperm.xlu1 %1200, %v1813_v7  }
  0xd7   : > { %1201 = vset.pattern.permute.xlu0 %v1507_v56 }
  0xd8   : > { %536 = vperm.xlu1 %1200, %v1825_v11   ;;  %637 = vperm.xlu0 %1201, %v1811_v6  }
  0xdc   : > { %1202 = vset.pattern.permute.xlu1 %v1507_v56  ;;  %649 = vperm.xlu0 %1201, %v1821_v9  }
  0xdd   : > { %641 = vperm.xlu1 %1202, %v1819_v8  }
  0xe1   : > { %645 = vperm.xlu1 %1202, %v1813_v7  }
  0xe5   : > { %653 = vperm.xlu1 %1202, %v1825_v11  }
 0x13d   : > { %v362_v17 = vpop.permute.xlu0 %361 }
 0x13e   : > { %v372_v18 = vpop.permute.xlu1 %371 }
 0x141   : > { %v367_v19 = vpop.permute.xlu0 %366 }
 0x142   : > { %v377_v20 = vpop.permute.xlu1 %376 }
 0x145   : > { %v382_v24 = vpop.permute.xlu0 %381 }
 0x146   : > { %v387_v28 = vpop.permute.xlu1 %386 }
 0x149   : > { %v392_v34 = vpop.permute.xlu0 %391 }
 0x14a   : > { %v397_v36 = vpop.permute.xlu1 %396 }
 0x14e   : > { %v521_v57 = vpop.permute.xlu0 %520 }
 0x14f   : > { %v525_v60 = vpop.permute.xlu1 %524 }
 0x152   : > { %v533_v3 = vpop.permute.xlu0 %532 }
 0x153   : > { %v529_v5 = vpop.permute.xlu1 %528 }
 0x157   : > { %v537_v11 = vpop.permute.xlu1 %536 }
 0x194   : > { %v1032_v21 = vpop.f32.mrb[0].mxu0 }
 0x195   : > { %v475_v22 = vpop.f32.mrb[1].mxu0  ;;  %v484_v25 = vadd.f32 %v1032_v21, %v372_v18 }
 0x196   : > { %v1033_v23 = vpop.f32.mrb[2].mxu0  ;;  %v476_v29 = vadd.f32 %v475_v22, %v362_v17  ;;  %v681_v22 = vsel %vm679_vm6, 4294967295, %v1506_v47 }
 0x197   : > { %v487_v26 = vadd.f32 %v1033_v23, %v377_v20  ;;  %v478_v27 = vpop.f32.mrb[3].mxu0  ;;  %v682_v23 = vsel %vm680_vm7, %v681_v22, 0 }
 0x198   : > { %v479_v30 = vadd.f32 %v478_v27, %v367_v19  ;;  %v1216_v27 = vld [vmem:[#allocation8 + $0x8] sm:$0xff]  }
 0x199   : > { %v507_v31 = vpack.c.bf16 %v487_v26, %v484_v25  ;;  %v1215_v26 = vld [vmem:[#allocation8] sm:$0xff]  }
 0x19a   : > { %v506_v32 = vpack.c.bf16 %v479_v30, %v476_v29  ;;  %v1508_v29 = vmov 3   ;;  %v1509_v30 = vmov 4  }
 0x19b   : > { %1203 = vset.pattern.permute.xlu0 %v1508_v29  ;;  %1204 = vset.pattern.permute.xlu1 %v1509_v30 }
 0x19c   : > { %1218 = vtanh.bf16 %v506_v32  ;;  %v1036_v33 = vpop.f32.mrb[4].mxu0  ;;  %750 = vperm.xlu0 %1203, %v1811_v6   ;;  %820 = vperm.xlu1 %1204, %v1811_v6   ;;  %v638_v32 = vpop.permute.xlu0 %637 }
 0x19d   : > { %v491_v35 = vpop.f32.mrb[5].mxu0  ;;  %v500_v38 = vadd.f32 %v1036_v33, %v392_v34  ;;  %1220 = vtanh.bf16 %v507_v31  ;;  %v1510_v31 = vmov 5  }
 0x19e   : > { %v1037_v37 = vpop.f32.mrb[6].mxu0  ;;  %v492_v41 = vadd.f32 %v491_v35, %v382_v24  ;;  %v642_v35 = vpop.permute.xlu1 %641 }
 0x19f   : > { %v503_v39 = vadd.f32 %v1037_v37, %v397_v36  ;;  %v494_v40 = vpop.f32.mrb[7].mxu0 }
 0x1a0   : > { %v495_v42 = vadd.f32 %v494_v40, %v387_v28  ;;  %v1217_v28 = vld [vmem:[#allocation8 + $0x10] ss:$0 sps:$4 sm:$0x33]   ;;  %1205 = vset.pattern.permute.xlu1 %v1510_v31  ;;  %1206 = vset.pattern.permute.xlu0 %v1510_v31 }
 0x1a1   : > { %v509_v43 = vpack.c.bf16 %v503_v39, %v500_v38  ;;  %825 = vperm.xlu1 %1205, %v1811_v6  }
 0x1a2   : > { %v508_v44 = vpack.c.bf16 %v495_v42, %v492_v41  ;;  %v650_v41 = vpop.permute.xlu0 %649 }
 0x1a3   : > { %1222 = vtanh.bf16 %v509_v43 }
 0x1a4   : > { %1224 = vtanh.bf16 %v508_v44  ;;  %v646_v44 = vpop.permute.xlu1 %645 }
 0x1a7   : > { %v1219_v45 = vpop.eup %1218 }
 0x1a8   : > { %1039 = vmatpush3.bf16.msra.mxu1 %v1219_v45  ;;  %v1221_v46 = vpop.eup %1220  ;;  %v654_v6 = vpop.permute.xlu1 %653 }
 0x1a9   : > { %1040 = vmatprep.subr.bf16.mxu1 %v1503_v15 }
 0x1ac   : > { %1041 = vmatpush3.bf16.msra.mxu1 %v1221_v46 }
 0x1ad   : > { %1042 = vmatprep.subr.bf16.mxu1 %v1503_v15 }
 0x1ae   : > { %v1223_v49 = vpop.eup %1222 }
 0x1af   : > { %v1225_v50 = vpop.eup %1224  ;;  %v567_v52 = vand.u32 %v1223_v49, %v565_v51 }
 0x1b0   : > { %1043 = vmatpush3.bf16.msra.mxu1 %v1225_v50 }
 0x1b1   : > { %1044 = vmatprep.subr.bf16.mxu1 %v1503_v15 }
 0x1b4   : > { %1045 = vmatpush3.bf16.msra.mxu1 %v567_v52 }
 0x1b5   : > { %1076 = vmatprep.subr.bf16.mxu1 %v1503_v15 }
 0x1b7   : > { %1047 = vmatmul.mubr.msk.bf16.vlgmr.msra.gmra.mrb[0].mxu1 %vm552_vm5, %v1212_v53 }
 0x1b8   : > { %1050 = vmatprep.mubr.msk.bf16.mxu1 %vm1504_vm2, %v1503_v15 }
 0x1bf   : > { %1051 = vmatmul.mubr.msk.bf16.gmra.mrb[4].mxu1 %vm552_vm5, %v1213_v54 }
 0x1c0   : > { %1054 = vmatprep.mubr.msk.bf16.mxu1 %vm1504_vm2, %v1503_v15 }
 0x1c7   : > { %1055 = vmatmul.mubr.msk.bf16.gmra.mrb[8].mxu1 %vm552_vm5, %v1214_v55 }
 0x1c8   : > { %1082 = vmatprep.mubr.msk.bf16.mxu1 %vm1504_vm2, %v1503_v15 }
 0x28a   : > { %v603_v58 = vpop.f32.mrb[0].mxu1 }
 0x28b   : > { %v1048_v59 = vpop.f32.mrb[1].mxu1  ;;  %v604_v62 = vadd.f32 %v603_v58, %v521_v57 }
 0x28c   : > { %v606_v61 = vpop.f32.mrb[2].mxu1 }
 0x28d   : > { %v607_v63 = vadd.f32 %v606_v61, %v525_v60  ;;  %v1049_v0 = vpop.f32.mrb[3].mxu1  ;;  %v748_v60 = vld [vmem:[#allocation10] sm:$0x3]  ;;  %v751_v61 = vpop.permute.xlu0 %750 }
 0x28f   : > { %v625_v1 = vpack.c.bf16 %v607_v63, %v604_v62 }
 0x291   : > { %1226 = vtanh.bf16 %v625_v1 }
 0x292   : > { %v611_v2 = vpop.f32.mrb[4].mxu1 }
 0x293   : > { %v1052_v4 = vpop.f32.mrb[5].mxu1  ;;  %v612_v7 = vadd.f32 %v611_v2, %v529_v5 }
 0x294   : > { %v614_v8 = vpop.f32.mrb[6].mxu1 }
 0x295   : > { %v615_v10 = vadd.f32 %v614_v8, %v533_v3  ;;  %v1053_v9 = vpop.f32.mrb[7].mxu1 }
 0x297   : > { %v626_v12 = vpack.c.bf16 %v615_v10, %v612_v7 }
 0x299   : > { %1228 = vtanh.bf16 %v626_v12 }
 0x29a   : > { %v619_v13 = vpop.f32.mrb[8].mxu1 }
 0x29b   : > { %v620_v14 = vadd.f32 %v619_v13, %v537_v11  ;;  %v1056_v16 = vpop.f32.mrb[9].mxu1 }
 0x29c   : > { %v1227_v17 = vpop.eup %1226  ;;  %v622_v18 = vpop.f32.mrb[10].mxu1 }
 0x29d   : > { %v627_v19 = vpack.c.bf16 %v620_v14, %v620_v14  ;;  %v1057_v20 = vpop.f32.mrb[11].mxu1  ;;  %1059 = vmatpush3.bf16.msra.mxu0 %v1227_v17 }
 0x29e   : > { %1060 = vmatprep.subr.bf16.mxu0 %v1503_v15 }
 0x29f   : > { %1230 = vtanh.bf16 %v627_v19 }
 0x2a4   : > { %v1229_v21 = vpop.eup %1228 }
 0x2a5   : > { %1061 = vmatpush3.bf16.msra.mxu0 %v1229_v21  ;;  %v821_v21 = vpop.permute.xlu1 %820 }
 0x2a6   : > { %1062 = vmatprep.subr.bf16.mxu0 %v1503_v15 }
 0x2aa   : > { %v1231_v24 = vpop.eup %1230 }
 0x2ab   : > { %v684_v25 = vand.u32 %v1231_v24, %v682_v23  ;;  %v826_v24 = vpop.permute.xlu1 %825 }
 0x2ad   : > { %1063 = vmatpush3.bf16.msra.mxu0 %v684_v25 }
 0x2b0   : > { %1065 = vmatmul.mubr.msk.bf16.vlgmr.msra.gmra.mrb[8].mxu0 %vm669_vm8, %v1215_v26 }
 0x2b1   : > { %1068 = vmatprep.mubr.msk.bf16.mxu0 %vm1504_vm2, %v1503_v15 }
 0x2b8   : > { %1069 = vmatmul.mubr.msk.bf16.gmra.mrb[12].mxu0 %vm669_vm8, %v1216_v27 }
 0x2b9   : > { %1072 = vmatprep.mubr.msk.bf16.mxu0 %vm1504_vm2, %v1503_v15 }
 0x2c0   : > { %1073 = vmatmul.mubr.msk.bf16.gmra.mrb[16].mxu0 %vm669_vm8, %v1217_v28 }
 0x383   : > { %v720_v33 = vpop.f32.mrb[8].mxu0 }
 0x384   : > { %v1066_v34 = vpop.f32.mrb[9].mxu0  ;;  %v721_v37 = vadd.f32 %v720_v33, %v638_v32 }
 0x385   : > { %v723_v36 = vpop.f32.mrb[10].mxu0 }
 0x386   : > { %v724_v38 = vadd.f32 %v723_v36, %v642_v35  ;;  %v1067_v39 = vpop.f32.mrb[11].mxu0 }
 0x388   : > { %v742_v40 = vpack.c.bf16 %v724_v38, %v721_v37 }
 0x38a   : > { %1232 = vtanh.bf16 %v742_v40 }
 0x38b   : > { %v728_v42 = vpop.f32.mrb[12].mxu0 }
 0x38c   : > { %v1070_v43 = vpop.f32.mrb[13].mxu0  ;;  %v729_v46 = vadd.f32 %v728_v42, %v646_v44 }
 0x38d   : > { %v731_v45 = vpop.f32.mrb[14].mxu0 }
 0x38e   : > { %v732_v47 = vadd.f32 %v731_v45, %v650_v41  ;;  %v1071_v48 = vpop.f32.mrb[15].mxu0 }
 0x390   : > { %v743_v49 = vpack.c.bf16 %v732_v47, %v729_v46 }
 0x392   : > { %1234 = vtanh.bf16 %v743_v49 }
 0x393   : > { %v736_v50 = vpop.f32.mrb[16].mxu0 }
 0x394   : > { %v737_v51 = vadd.f32 %v736_v50, %v654_v6  ;;  %v1074_v52 = vpop.f32.mrb[17].mxu0 }
 0x395   : > { %v1233_v53 = vpop.eup %1232  ;;  %v739_v54 = vpop.f32.mrb[18].mxu0 }
 0x396   : > { %v744_v55 = vpack.c.bf16 %v737_v51, %v737_v51  ;;  %v1075_v56 = vpop.f32.mrb[19].mxu0  ;;  %1077 = vmatpush3.bf16.msra.mxu1 %v1233_v53 }
 0x397   : > { %1078 = vmatprep.subr.bf16.mxu1 %v1503_v15 }
 0x398   : > { %1236 = vtanh.bf16 %v744_v55 }
 0x39d   : > { %v1235_v57 = vpop.eup %1234 }
 0x39e   : > { %1079 = vmatpush3.bf16.msra.mxu1 %v1235_v57 }
 0x39f   : > { %1080 = vmatprep.subr.bf16.mxu1 %v1503_v15 }
 0x3a3   : > { %v1237_v58 = vpop.eup %1236 }
 0x3a4   : > { %v757_v59 = vand.u32 %v1237_v58, %v682_v23 }
 0x3a6   : > { %1081 = vmatpush3.bf16.msra.mxu1 %v757_v59 }
 0x3a9   : > { %1083 = vmatmul.mubr.msk.bf16.vlgmr.msra.gmra.mrb[12].mxu1 %vm669_vm8, %v748_v60 }
 0x47c   : > { %v793_v62 = vpop.f32.mrb[12].mxu1 }
 0x47d   : > { %v794_v63 = vadd.f32 %v793_v62, %v751_v61  ;;  %v1084_v0 = vpop.f32.mrb[13].mxu1 }
 0x47e   : > { %v796_v1 = vpop.f32.mrb[14].mxu1 }
 0x47f   : > { %v800_v2 = vsel %vm799_vm9, %v794_v63, -inf  ;;  %v1085_v3 = vpop.f32.mrb[15].mxu1 }
 0x480   : > { %v801_v4 = vrot.slane %v800_v2, 4 }
 0x482   : > { %v802_v5 = vmax.f32 %v800_v2, %v801_v4 }
 0x484   : > { %v803_v8 = vrot.slane %v802_v5, 2 }
 0x486   : > { %v804_v7 = vmax.f32 %v802_v5, %v803_v8 }
 0x488   : > { %v805_v15 = vrot.slane %v804_v7, 1 }
 0x48a   : > { %v806_v10 = vmax.f32 %v804_v7, %v805_v15 }
 0x48c   : > { %v807_v9 = vsub.f32 %v794_v63, %v806_v10 }
 0x48e   : > { %v808_v12 = vmul.f32 1.442695, %v807_v9 }
 0x490   : > { %1238 = vpow2.f32 %v808_v12 }
 0x49a   : > { %v1239_v11 = vpop.eup %1238 }
 0x49b   : > { %v810_v13 = vsel %vm799_vm9, %v1239_v11, 0.0 }
 0x49c   : > { %v811_v14 = vrot.slane %v810_v13, 4 }
 0x49e   : > { %v812_v16 = vadd.f32 %v811_v14, %v810_v13 }
 0x4a0   : > { %v813_v17 = vrot.slane %v812_v16, 2 }
 0x4a2   : > { %v814_v18 = vadd.f32 %v813_v17, %v812_v16 }
 0x4a4   : > { %v815_v19 = vrot.slane %v814_v18, 1 }
 0x4a6   : > { %v816_v20 = vadd.f32 %v815_v19, %v814_v18 }
 0x4a8   : > { %1240 = vrcp.f32 %v816_v20 }
 0x4b2   : > { %v1241_v22 = vpop.eup %1240 }
 0x4b3   : > { %v818_v23 = vmul.f32 %v1241_v22, %v1239_v11 }
 0x4b5   : > { %v823_v25 = vmul.f32 %v821_v21, %v818_v23 }
 0x4b7   : > { %v828_v26 = vadd.f32 %v826_v24, %v823_v25 }
 0x4b9   : > { %829 = vst [vmem:[%s339_s30] sm:$0x7] %v828_v26 }
 0x4ba   : > { %1425 = shalt.err (!%p1422_p0)
}
 0x4bb   : > { %s1426_s7 = scalar_lea.hbm %s1877_s12, 64  ;;  %s1430_s18 = scalar_lea.hbm %s1927_s6, 128 }
 0x4bc   : > { %p1427_p4 = scmp.ne.s32.totalorder %s1877_s12, %s1426_s7  ;;  %p1431_p6 = scmp.lt.u32.totalorder %s1877_s12, %s1927_s6 }
 0x4bd   : > { %p1432_p10 = scmp.lt.u32.totalorder %s1430_s18, %s1426_s7  ;;  %p1434_p7 = scmp.lt.u32.totalorder %s1426_s7, %s1877_s12 }
 0x4be   : > { %p1428_p11 = pnand %p1427_p4, %p1739_p5 }
 0x4bf   : > { %p1433_p3 = por %p1432_p10, %p1431_p6 }
 0x4c0   : > { %p1429_p8 = pneg %p1428_p11 }
 0x4c1   : > { %p1435_p12 = por %p1434_p7, %p1433_p3 }
 0x4c3   : > { %p1436_p1 = pnand %p1435_p12, %p1429_p8 }
 0x4c5   : > { %1439 = shalt.err (!%p1436_p1)
}
 0x4c6   : > { %1109 = dma.vmem_to_hbm [thread:$0]  (%p1739_p5), %s1879_s9, 64, %s1877_s12, %s831_s11  }
 0x4c7 PF: > { %s856_s29 = sand.u32 1, %s1478_s21   ;;  %p1949_p2 = scmp.ne.s32.totalorder %s1933_s28, 0 }
 0x4c8   : > { %p1950_p13 = scmp.ge.s32.totalorder %s1490_s24, 2  ;;  %s857_s30 = scalar_lea.sflag [#allocation4], %s856_s29 }
 0x4ca   : > { %p1132_p9 = pnand %p1950_p13, %p1949_p2 }
 0x4cc   : > { %1473 = dma.done.wait (!%p1132_p9), %s857_s30, 64  }
 0x4cd   : > { %1475 = vsyncadd (!%p1132_p9), %s857_s30, 4294967232  ;;  %p22_p0 = scmp.ge.s32.totalorder %s1725_s13, 4   ;;  %s1951_s21 = smov %s1482_s22 }
 0x4ce   : > { %s1952_s22 = smov %s1486_s23  ;;  %s1953_s23 = smov %s1735_s17 }
 0x4cf   : > { %s1954_s24 = smov %s1725_s13  ;;  %24 = sbr.rel (!%p22_p0) target bundleno = 10 (0xa), region = 109 }
 0x4d6   :  { %862 = vsyncpa [#allocation3], 1 }
 0x4d7   :  { %864 = vsyncpa [#allocation3 + $0x1], 1 }
 0x4d8   :  { %865 = vsyncpa [#allocation6], 1 }
 0x4d9   :  { %866 = vsyncpa [#allocation9], 1 }
 0x4da   :  { %867 = vsyncpa [#allocation12], 1 }
 0x4db   :  { %868 = vsyncpa [#allocation4], 1 }
 0x4dc   :  { %870 = vsyncpa [#allocation4 + $0x1], 1 }

</bundles_post_ra>
